<compile_context>
chip_gen: v7x
topology: tpu7x:2x2x1
jax: 0.10.0
libtpu: 0.0.40
codegen_flags: <defaults>
</compile_context>

<pallas_src>
import functools

import jax
import jax.numpy as jnp
from jax import lax
from jax.experimental import pallas as pl
from jax.experimental.pallas import tpu as pltpu


def _tile(dim: int, target: int) -> int:
    """Largest divisor of `dim` that is <= target (dim itself if small)."""
    t = min(dim, target)
    while dim % t:
        t -= 1
    return t


# ----------------------------------------------------------------------------
# Tiled GEMM (used for the qkv and proj Linear layers, bias=False)
# ----------------------------------------------------------------------------
def _matmul_kernel(x_ref, w_ref, o_ref, acc_ref):
    @pl.when(pl.program_id(2) == 0)
    def _init():
        acc_ref[...] = jnp.zeros_like(acc_ref)

    acc_ref[...] += jnp.dot(x_ref[...], w_ref[...],
                            preferred_element_type=jnp.float32)

    @pl.when(pl.program_id(2) == pl.num_programs(2) - 1)
    def _store():
        o_ref[...] = acc_ref[...].astype(o_ref.dtype)


def pallas_linear(x2d, w, *, tm=256, tn=256, tk=512):
    """x2d: (M, K), w: (K, Nout) -> (M, Nout)."""
    M, K = x2d.shape
    Nout = w.shape[1]
    tm, tn, tk = _tile(M, tm), _tile(Nout, tn), _tile(K, tk)
    grid = (M // tm, Nout // tn, K // tk)
    return pl.pallas_call(
        _matmul_kernel,
        out_shape=jax.ShapeDtypeStruct((M, Nout), x2d.dtype),
        grid_spec=pltpu.PrefetchScalarGridSpec(
            num_scalar_prefetch=0,
            grid=grid,
            in_specs=[pl.BlockSpec((tm, tk), lambda i, j, k: (i, k)),
                      pl.BlockSpec((tk, tn), lambda i, j, k: (k, j))],
            out_specs=pl.BlockSpec((tm, tn), lambda i, j, k: (i, j)),
            scratch_shapes=[pltpu.VMEM((tm, tn), jnp.float32)]),
        compiler_params=pltpu.CompilerParams(
            dimension_semantics=("parallel", "parallel", "arbitrary"),
            vmem_limit_bytes=48 * 1024 * 1024),
    )(x2d, w)


# ----------------------------------------------------------------------------
# Flash-style sigmoid attention
# ----------------------------------------------------------------------------
def _sigmoid_flash_kernel(q_ref, k_ref, v_ref, o_ref, acc_ref, *,
                          num_heads, tq, tk, scale, sigmoid_bias, causal):
    # q_ref: (tq, H, Dh), k_ref/v_ref: (tk, H, Dh), o_ref: (tq, H, Dh)
    # acc_ref: (H, tq, Dh) float32 scratch, persistent across the KV axis.
    qi = pl.program_id(1)
    ki = pl.program_id(2)
    nk = pl.num_programs(2)

    @pl.when(ki == 0)
    def _init():
        acc_ref[...] = jnp.zeros_like(acc_ref)

    def compute(apply_mask):
        if apply_mask:
            row = qi * tq + lax.broadcasted_iota(jnp.int32, (tq, tk), 0)
            col = ki * tk + lax.broadcasted_iota(jnp.int32, (tq, tk), 1)
            keep = col <= row
        for h in range(num_heads):
            # Fold the Dh^-0.5 scale into q (cheap: tq*Dh mults per head).
            q = q_ref[:, h, :] * jnp.asarray(scale, q_ref.dtype)     # (tq, Dh)
            k = k_ref[:, h, :]                                        # (tk, Dh)
            v = v_ref[:, h, :]                                        # (tk, Dh)
            # QK^T without materializing k.T: contract Dh of both operands.
            s = lax.dot_general(q, k, (((1,), (1,)), ((), ())),
                                preferred_element_type=jnp.float32)   # (tq, tk)
            s = s + sigmoid_bias
            # sigmoid(s) == 0.5 * tanh(0.5 * s) + 0.5  (one EUP op / element)
            p = 0.5 * jnp.tanh(0.5 * s) + 0.5
            if apply_mask:
                p = jnp.where(keep, p, 0.0)   # masked keys contribute 0
            acc_ref[h] += jnp.dot(p.astype(v.dtype), v,
                                  preferred_element_type=jnp.float32)

    if causal:
        q_lo = qi * tq
        q_hi = q_lo + tq - 1
        k_lo = ki * tk
        k_hi = k_lo + tk - 1
        run = k_lo <= q_hi          # tile has at least one unmasked element
        diag = k_hi > q_lo          # tile straddles the diagonal -> needs mask

        @pl.when(jnp.logical_and(run, diag))
        def _masked():
            compute(True)

        @pl.when(jnp.logical_and(run, jnp.logical_not(diag)))
        def _unmasked():
            compute(False)
    else:
        compute(False)

    @pl.when(ki == nk - 1)
    def _finalize():
        for h in range(num_heads):
            o_ref[:, h, :] = acc_ref[h].astype(o_ref.dtype)


def pallas_sigmoid_attention(qkv, *, num_heads, sigmoid_bias, causal=True,
                             q_tile=256, kv_tile=256):
    """qkv: (B, N, 3, H, Dh) -> attention output (B, N, H, Dh)."""
    B, N, three, H, Dh = qkv.shape
    assert three == 3 and H == num_heads
    tq = _tile(N, q_tile)
    tk = _tile(N, kv_tile)
    scale = float(Dh) ** -0.5   # q,k each prescaled by Dh^-0.25 in the module

    if causal:
        def kv_block(qi, ki):
            # Clamp skipped (fully masked) KV steps to the last needed block
            # so no new DMA is issued for them.
            return jnp.minimum(ki, (qi * tq + tq - 1) // tk)
    else:
        def kv_block(qi, ki):
            return ki

    q_spec = pl.BlockSpec((None, tq, None, H, Dh),
                          lambda b, qi, ki: (b, qi, 0, 0, 0))
    k_spec = pl.BlockSpec((None, tk, None, H, Dh),
                          lambda b, qi, ki: (b, kv_block(qi, ki), 1, 0, 0))
    v_spec = pl.BlockSpec((None, tk, None, H, Dh),
                          lambda b, qi, ki: (b, kv_block(qi, ki), 2, 0, 0))
    o_spec = pl.BlockSpec((None, tq, H, Dh),
                          lambda b, qi, ki: (b, qi, 0, 0))

    kernel = functools.partial(
        _sigmoid_flash_kernel,
        num_heads=H, tq=tq, tk=tk,
        scale=scale, sigmoid_bias=float(sigmoid_bias), causal=causal)

    out = pl.pallas_call(
        kernel,
        out_shape=jax.ShapeDtypeStruct((B, N, H, Dh), qkv.dtype),
        grid_spec=pltpu.PrefetchScalarGridSpec(
            num_scalar_prefetch=0,
            grid=(B, N // tq, N // tk),
            in_specs=[q_spec, k_spec, v_spec],
            out_specs=o_spec,
            scratch_shapes=[pltpu.VMEM((H, tq, Dh), jnp.float32)]),
        compiler_params=pltpu.CompilerParams(
            dimension_semantics=("parallel", "parallel", "arbitrary"),
            vmem_limit_bytes=48 * 1024 * 1024),
    )(qkv, qkv, qkv)
    return out


# ----------------------------------------------------------------------------
# Forward pass mirroring FlashSigmoidAttention.forward
# ----------------------------------------------------------------------------
def flash_sigmoid_attention_forward(x, params, *, num_heads, sigmoid_bias,
                                    causal=True, q_tile=256, kv_tile=256):
    """x: (B, N, C). params: 'w_qkv' (C, 3C), 'w_proj' (C, C) (already x@w form).

    Returns {'attn_times_v': (B, N, C), 'attn_proj': (B, N, C)}.
    """
    B, N, C = x.shape
    H = num_heads
    Dh = C // H

    # QKV projection (tiled GEMM); reshape is free (row-major contiguous).
    qkv = pallas_linear(x.reshape(B * N, C), params["w_qkv"])       # (B*N, 3C)
    qkv = qkv.reshape(B, N, 3, H, Dh)

    # Flash sigmoid attention; output layout (B, N, H, Dh) == (B, N, C) free.
    o = pallas_sigmoid_attention(qkv, num_heads=H, sigmoid_bias=sigmoid_bias,
                                 causal=causal, q_tile=q_tile, kv_tile=kv_tile)
    attn_times_v = o.reshape(B, N, C)

    # Output projection (proj_drop p=0.0 -> identity).
    # TODO(synk): could be fused into the attention epilogue to save one HBM
    # read of attn_times_v; kept separate for clarity.
    attn_proj = pallas_linear(attn_times_v.reshape(B * N, C),
                              params["w_proj"]).reshape(B, N, C)

    return {"attn_times_v": attn_times_v, "attn_proj": attn_proj}


# ----------------------------------------------------------------------------
# Pure-JAX reference (sanity check)
# ----------------------------------------------------------------------------
def reference_forward(x, params, *, num_heads, sigmoid_bias, causal=True):
    B, N, C = x.shape
    H = num_heads
    Dh = C // H
    qkv = (x.reshape(B * N, C) @ params["w_qkv"]).reshape(B, N, 3, H, Dh)
    q, k, v = qkv[:, :, 0], qkv[:, :, 1], qkv[:, :, 2]
    scale = Dh ** -0.5
    s = jnp.einsum("bqhd,bkhd->bhqk", q, k) * scale + sigmoid_bias
    p = jax.nn.sigmoid(s)
    if causal:
        mask = jnp.tril(jnp.ones((N, N), dtype=bool))
        p = jnp.where(mask[None, None], p, 0.0)
    o = jnp.einsum("bhqk,bkhd->bqhd", p, v).reshape(B, N, C)
    proj = (o.reshape(B * N, C) @ params["w_proj"]).reshape(B, N, C)
    return {"attn_times_v": o, "attn_proj": proj}


# ----------------------------------------------------------------------------
# Main
# ----------------------------------------------------------------------------
if __name__ == "__main__":
    # Small shapes consistent with the module: dim=32, num_heads=4 -> head_dim=8
    B, N, C = 2, 16, 32
    num_heads = 4
    sigmoid_bias = -2.0
    causal = True

    key = jax.random.PRNGKey(0)
    kx, kqkv, kproj = jax.random.split(key, 3)

    x = jax.random.normal(kx, (B, N, C), dtype=jnp.float32)
    # nn.Linear-style uniform init, stored transposed so kernels compute x @ w.
    bound = 1.0 / (C ** 0.5)
    w_qkv = jax.random.uniform(kqkv, (C, 3 * C), jnp.float32, -bound, bound)
    w_proj = jax.random.uniform(kproj, (C, C), jnp.float32, -bound, bound)
    params = {"w_qkv": w_qkv, "w_proj": w_proj}

    out = flash_sigmoid_attention_forward(
        x, params, num_heads=num_heads, sigmoid_bias=sigmoid_bias, causal=causal
    )
    jax.block_until_ready(out)

    ref = reference_forward(
        x, params, num_heads=num_heads, sigmoid_bias=sigmoid_bias, causal=causal
    )
    assert jnp.allclose(out["attn_times_v"], ref["attn_times_v"], rtol=1e-3, atol=1e-3)
    assert jnp.allclose(out["attn_proj"], ref["attn_proj"], rtol=1e-3, atol=1e-3)

    print("KERNEL_OK")
</pallas_src>

<mosaic_0001>
module attributes {stable_mosaic.version = 11 : i64} {
  func.func @_matmul_kernel(%arg0: i32, %arg1: i32, %arg2: i32, %arg3: memref<32x32xf32, #tpu.memory_space<vmem>>, %arg4: memref<32x96xf32, #tpu.memory_space<vmem>>, %arg5: memref<32x96xf32, #tpu.memory_space<vmem>>, %arg6: memref<32x96xf32, #tpu.memory_space<vmem>>) attributes {dimension_semantics = [#tpu.dimension_semantics<parallel>, #tpu.dimension_semantics<parallel>, #tpu.dimension_semantics<arbitrary>], iteration_bounds = array<i64: 1, 1, 1>, scalar_prefetch = 0 : i64, scratch_operands = 1 : i64, tpu.core_type = #tpu.core_type<tc>, window_params = [{transform_indices = @transform_0, window_bounds = array<i64: 32, 32>}, {transform_indices = @transform_1, window_bounds = array<i64: 32, 96>}, {transform_indices = @transform_2, window_bounds = array<i64: 32, 96>}]} {
    %c0_i32 = arith.constant 0 : i32
    %0 = arith.cmpi eq, %arg2, %c0_i32 : i32
    %1 = arith.extui %0 : i1 to i32
    %c0_i32_0 = arith.constant 0 : i32
    %2 = arith.cmpi ne, %1, %c0_i32_0 : i32
    scf.if %2 {
      %cst_10 = arith.constant 0.000000e+00 : f32
      %12 = vector.broadcast %cst_10 : f32 to vector<32x96xf32>
      %c0_11 = arith.constant 0 : index
      %c0_12 = arith.constant 0 : index
      %13 = vector.load %arg6[%c0_11, %c0_12] : memref<32x96xf32, #tpu.memory_space<vmem>>, vector<32x96xf32>
      tpu.vector_store %arg6[%c0_11, %c0_12], %12 {strides = array<i32>} : memref<32x96xf32, #tpu.memory_space<vmem>>, vector<32x96xf32>,
    } else {
    }
    %c0 = arith.constant 0 : index
    %c0_1 = arith.constant 0 : index
    %3 = vector.load %arg6[%c0, %c0_1] : memref<32x96xf32, #tpu.memory_space<vmem>>, vector<32x96xf32>
    %c0_2 = arith.constant 0 : index
    %c0_3 = arith.constant 0 : index
    %4 = vector.load %arg3[%c0_2, %c0_3] : memref<32x32xf32, #tpu.memory_space<vmem>>, vector<32x32xf32>
    %c0_4 = arith.constant 0 : index
    %c0_5 = arith.constant 0 : index
    %5 = vector.load %arg4[%c0_4, %c0_5] : memref<32x96xf32, #tpu.memory_space<vmem>>, vector<32x96xf32>
    %cst = arith.constant dense<0.000000e+00> : vector<32x96xf32>
    %6 = tpu.matmul %4, %5, %cst {dimension_numbers = #tpu.dot_dimension_numbers<[1], [0], [0], [1], [0, 0, 1, 1], [], []>} : vector<32x32xf32>, vector<32x96xf32>, vector<32x96xf32> -> vector<32x96xf32>
    %7 = arith.addf %3, %6 : vector<32x96xf32>
    %c0_6 = arith.constant 0 : index
    %c0_7 = arith.constant 0 : index
    %8 = vector.load %arg6[%c0_6, %c0_7] : memref<32x96xf32, #tpu.memory_space<vmem>>, vector<32x96xf32>
    tpu.vector_store %arg6[%c0_6, %c0_7], %7 {strides = array<i32>} : memref<32x96xf32, #tpu.memory_space<vmem>>, vector<32x96xf32>,
    %c0_i32_8 = arith.constant 0 : i32
    %9 = arith.cmpi eq, %arg2, %c0_i32_8 : i32
    %10 = arith.extui %9 : i1 to i32
    %c0_i32_9 = arith.constant 0 : i32
    %11 = arith.cmpi ne, %10, %c0_i32_9 : i32
    scf.if %11 {
      %c0_10 = arith.constant 0 : index
      %c0_11 = arith.constant 0 : index
      %12 = vector.load %arg6[%c0_10, %c0_11] : memref<32x96xf32, #tpu.memory_space<vmem>>, vector<32x96xf32>
      %c0_12 = arith.constant 0 : index
      %c0_13 = arith.constant 0 : index
      %13 = vector.load %arg5[%c0_12, %c0_13] : memref<32x96xf32, #tpu.memory_space<vmem>>, vector<32x96xf32>
      tpu.vector_store %arg5[%c0_12, %c0_13], %12 {strides = array<i32>} : memref<32x96xf32, #tpu.memory_space<vmem>>, vector<32x96xf32>,
    } else {
    }
    return
  }
  func.func @transform_0(%arg0: i32, %arg1: i32, %arg2: i32) -> (i32, i32) {
    %c0_i32 = arith.constant 0 : i32
    return %arg0, %arg2 : i32, i32
  }
  func.func @transform_1(%arg0: i32, %arg1: i32, %arg2: i32) -> (i32, i32) {
    %c0_i32 = arith.constant 0 : i32
    return %arg2, %arg1 : i32, i32
  }
  func.func @transform_2(%arg0: i32, %arg1: i32, %arg2: i32) -> (i32, i32) {
    %c0_i32 = arith.constant 0 : i32
    return %arg0, %arg1 : i32, i32
  }
}

</mosaic_0001>

<bundles_post_ra>
// kernel: tpu_custom_call.1
= control target key start
LH: loop header
LB: loop body
LE: loop exit
PB: predicated region body
PF: predicated region fallthrough
CT: control target
= control target key end

     0   :  { %7 = vsyncpa [#allocation4], 0  ;;  %s395_s0 = inlined_call_operand.hbm [shape: f32[32,32], index: 0, kind: input, shape index: {}]   ;;  %s396_s1 = inlined_call_operand.hbm [shape: f32[32,96], index: 1, kind: input, shape index: {}]   ;;  %s397_s2 = inlined_call_operand.hbm [shape: f32[32,96], index: 2, kind: output, shape index: {}]  }
   0x1   :  { %8 = vsyncpa [#allocation7], 0 }
   0x2   :  { %9 = vsyncpa [#allocation5], 0  ;;  %s313_s9 = smov [#allocation3]   ;;  %s241_s13 = scalar_lea.hbm %s395_s0, 512 }
   0x3   :  { %s15_s10 = sshll.u32 %s313_s9, 4  ;;  %p242_p0 = scmp.ne.s32.totalorder %s395_s0, %s241_s13  ;;  %s16_s10 = int_to_ptr.vmem [resolvable:$true] %s15_s10 }
   0x4   :  { %p245_p1 = scmp.lt.u32.totalorder %s241_s13, %s395_s0 }
   0x6   :  { %p247_p2 = pnand %p245_p1, %p242_p0 }
   0x8   :  { %250 = shalt.err (!%p247_p2)
}
   0x9   :  { %s251_s18 = scalar_lea.vmem %s16_s10, 512  ;;  %p256_p4 = scmp.lt.s32.totalorder %s16_s10, %s16_s10 }
   0xa   :  { %p252_p3 = scmp.ne.s32.totalorder %s16_s10, %s251_s18  ;;  %p257_p5 = scmp.lt.s32.totalorder %s251_s18, %s251_s18 }
   0xc   :  { %p258_p6 = por %p257_p5, %p256_p4 }
   0xe   :  { %p259_p7 = pnand %p258_p6, %p252_p3 }
  0x10   :  { %262 = shalt.err (!%p259_p7)
}
  0x11   :  { %s314_s19 = smov 128   ;;  %s315_s20 = smov 8  }
  0x12   :  { %21 = dma.hbm_to_vmem [thread:$0]  %s395_s0, 512, %s16_s10, [#allocation4], %s314_s19, %s314_s19, %s315_s20  }
  0x13   :  { %s316_s23 = smov [#allocation6]   ;;  %s263_s27 = scalar_lea.hbm %s396_s1, 512 }
  0x14   :  { %s27_s24 = sshll.u32 %s316_s23, 4  ;;  %p264_p8 = scmp.ne.s32.totalorder %s396_s1, %s263_s27  ;;  %s28_s24 = int_to_ptr.vmem [resolvable:$true] %s27_s24 }
  0x15   :  { %p267_p9 = scmp.lt.u32.totalorder %s263_s27, %s396_s1 }
  0x17   :  { %p269_p10 = pnand %p267_p9, %p264_p8 }
  0x19   :  { %272 = shalt.err (!%p269_p10)
}
  0x1a   :  { %s273_s4 = scalar_lea.vmem %s28_s24, 512  ;;  %p278_p12 = scmp.lt.s32.totalorder %s28_s24, %s28_s24 }
  0x1b   :  { %p274_p11 = scmp.ne.s32.totalorder %s28_s24, %s273_s4  ;;  %p279_p13 = scmp.lt.s32.totalorder %s273_s4, %s273_s4 }
  0x1d   :  { %p280_p0 = por %p279_p13, %p278_p12 }
  0x1f   :  { %p281_p1 = pnand %p280_p0, %p274_p11 }
  0x21   :  { %284 = shalt.err (!%p281_p1)
}
  0x22   :  { %33 = dma.hbm_to_vmem [thread:$0]  %s396_s1, 512, %s28_s24, [#allocation7], %s314_s19, %s314_s19, %s315_s20  }
  0x23   :  { %307 = dma.done.wait [#allocation4], 512  }
  0x24   :  { %308 = vsyncadd [#allocation4], 4294966784 }
  0x25   :  { %309 = dma.done.wait [#allocation7], 512  }
  0x26   :  { %310 = vsyncadd [#allocation7], 4294966784  ;;  %vm44_vm0 = vcmask 785408   ;;  %v317_v0 = vmov 0.0   ;;  %vm61_vm1 = vcmask 261120   ;;  %v57_v1 = vld [vmem:[#allocation6] sm:$0xff] }
  0x27   :  { %46 = vst.msk [vmem:[#allocation2 + $0x8] sm:$0xff] %vm44_vm0, %v317_v0  ;;  %45 = vst.msk [vmem:[#allocation2] sm:$0xff] %vm44_vm0, %v317_v0  ;;  %v58_v2 = vld [vmem:[#allocation6 + $0x8] sm:$0xff]  ;;  %v59_v3 = vld [vmem:[#allocation6 + $0x10] sm:$0xff]  ;;  %s318_s1 = smov [#allocation8]  }
  0x28   :  { %47 = vst.msk [vmem:[#allocation2 + $0x10] sm:$0xff] %vm44_vm0, %v317_v0  ;;  %48 = vst.msk [vmem:[#allocation2 + $0x18] sm:$0xff] %vm44_vm0, %v317_v0  ;;  %v223_v4 = vpack.c.bf16 %v58_v2, %v57_v1  ;;  %v60_v5 = vld [vmem:[#allocation6 + $0x18] sm:$0xff]  ;;  %v53_v6 = vld [vmem:[#allocation3] sm:$0xff]  ;;  %s184_s6 = sshll.u32 %s318_s1, 4  ;;  %s185_s6 = int_to_ptr.vmem [resolvable:$true] %s184_s6 }
  0x29   :  { %v55_v7 = vld [vmem:[#allocation3 + $0x10] sm:$0xff]  ;;  %v227_v8 = vpack.c.bf16 %v60_v5, %v59_v3  ;;  %217 = vmatprep.mubr.msk.f32.mxu0 %vm61_vm1, %v53_v6  ;;  %v54_v9 = vld [vmem:[#allocation3 + $0x8] sm:$0xff]  ;;  %v56_v10 = vld [vmem:[#allocation3 + $0x18] sm:$0xff]  ;;  %s285_s7 = scalar_lea.vmem %s185_s6, 512  ;;  %p290_p3 = scmp.lt.s32.totalorder %s185_s6, %s185_s6 }
  0x2a   :  { %220 = vmatprep.mubr.msk.f32.mxu1 %vm61_vm1, %v55_v7  ;;  %224 = vmatprep.subr.bf16.mxu0 %v223_v4  ;;  %p286_p2 = scmp.ne.s32.totalorder %s185_s6, %s285_s7  ;;  %p291_p4 = scmp.lt.s32.totalorder %s285_s7, %s285_s7 }
  0x2b   :  { %231 = vmatprep.subr.bf16.mxu1 %v223_v4  ;;  %226 = vmatpush3.bf16.msra.mxu0 %v223_v4 }
  0x2c   :  { %233 = vmatpush3.bf16.msra.mxu1 %v223_v4  ;;  %228 = vmatprep.subr.bf16.mxu0 %v227_v8  ;;  %p292_p5 = por %p291_p4, %p290_p3 }
  0x2d   :  { %232 = vmatprep.subr.bf16.mxu1 %v227_v8 }
  0x2e   :  { %v50_v11 = vld [vmem:[#allocation2 + $0x8] sm:$0xff]  ;;  %v49_v13 = vld [vmem:[#allocation2] sm:$0xff]  ;;  %p293_p6 = pnand %p292_p5, %p286_p2 }
  0x2f   :  { %230 = vmatpush3.bf16.msra.mxu0 %v227_v8  ;;  %v52_v12 = vld [vmem:[#allocation2 + $0x18] sm:$0xff]  ;;  %v51_v14 = vld [vmem:[#allocation2 + $0x10] sm:$0xff] }
  0x30   :  { %234 = vmatpush3.bf16.msra.mxu1 %v227_v8 }
  0x32   :  { %218 = vmatmul.mubr.msk.f32.vlgmr.msra.gmra.mrb[0].mxu0 %vm61_vm1, %v54_v9 }
  0x33   :  { %221 = vmatmul.mubr.msk.f32.vlgmr.msra.gmra.mrb[0].mxu1 %vm61_vm1, %v56_v10 }
 0x105   :  { %v219_v15 = vpop.f32.mrb[0].mxu0 }
 0x106   :  { %v222_v16 = vpop.f32.mrb[0].mxu1  ;;  %v160_v17 = vadd.f32 %v219_v15, %v50_v11  ;;  %v140_v19 = vpop.f32.mrb[1].mxu0 }
 0x107   :  { %v162_v18 = vadd.f32 %v222_v16, %v52_v12  ;;  %v150_v20 = vpop.f32.mrb[1].mxu1  ;;  %v159_v21 = vadd.f32 %v140_v19, %v49_v13 }
 0x108   :  { %v161_v22 = vadd.f32 %v150_v20, %v51_v14  ;;  %165 = vst.msk [vmem:[#allocation2 + $0x8] sm:$0xff] %vm44_vm0, %v160_v17 }
 0x109   :  { %167 = vst.msk [vmem:[#allocation2 + $0x18] sm:$0xff] %vm44_vm0, %v162_v18  ;;  %164 = vst.msk [vmem:[#allocation2] sm:$0xff] %vm44_vm0, %v159_v21 }
 0x10a   :  { %166 = vst.msk [vmem:[#allocation2 + $0x10] sm:$0xff] %vm44_vm0, %v161_v22 }
 0x10f   :  { %v172_v23 = vld [vmem:[#allocation2 + $0x8] sm:$0xff] }
 0x110   :  { %v174_v24 = vld [vmem:[#allocation2 + $0x18] sm:$0xff]  ;;  %v171_v25 = vld [vmem:[#allocation2] sm:$0xff]  ;;  %176 = vst.msk [vmem:[#allocation8 + $0x8] sm:$0xff] %vm44_vm0, %v172_v23 }
 0x111   :  { %v173_v26 = vld [vmem:[#allocation2 + $0x10] sm:$0xff]  ;;  %178 = vst.msk [vmem:[#allocation8 + $0x18] sm:$0xff] %vm44_vm0, %v174_v24  ;;  %175 = vst.msk [vmem:[#allocation8] sm:$0xff] %vm44_vm0, %v171_v25 }
 0x112   :  { %177 = vst.msk [vmem:[#allocation8 + $0x10] sm:$0xff] %vm44_vm0, %v173_v26 }
 0x113   :  { %296 = shalt.err (!%p293_p6)
}
 0x114   :  { %s297_s10 = scalar_lea.hbm %s397_s2, 512 }
 0x115   :  { %p298_p7 = scmp.ne.s32.totalorder %s397_s2, %s297_s10  ;;  %p301_p8 = scmp.lt.u32.totalorder %s297_s10, %s397_s2 }
 0x117   :  { %p303_p9 = pnand %p301_p8, %p298_p7 }
 0x119   :  { %306 = shalt.err (!%p303_p9)
}
 0x11a   :  { %190 = dma.vmem_to_hbm [thread:$0]  %s185_s6, 512, %s397_s2, [#allocation5], %s314_s19, %s314_s19, %s315_s20  }
 0x11b   :  { %311 = dma.done.wait [#allocation5], 512  }
 0x11c   :  { %312 = vsyncadd [#allocation5], 4294966784 }
 0x11d   :  { %194 = vsyncpa [#allocation4], 1 }
 0x11e   :  { %195 = vsyncpa [#allocation7], 1 }
 0x11f   :  { %196 = vsyncpa [#allocation5], 1 }

</bundles_post_ra>
